<compile_context>
chip_gen: v6e
topology: v6e:2x2x1
jax: 0.10.0
libtpu: 0.0.40
codegen_flags: <defaults>
</compile_context>

<pallas_src>
import jax
import jax.numpy as jnp
from jax.experimental import pallas as pl
from jax.experimental.pallas import tpu as pltpu

LANES = 512          # slab width (multiple of the 128-lane vreg width)
TILE_ROWS_MAX = 1024 # 1024 x 512 x 4B = 2 MiB per tile (x4 double-buffered = 8 MiB VMEM)
MIN_GRID = 8         # keep >= ~8 grid steps when possible (>= 4 per v7x TensorCore)
SMALL_N = 4096       # below this, a fused XLA elementwise op beats a kernel launch


def _round_up(a: int, m: int) -> int:
    return ((a + m - 1) // m) * m


def linear_kernel(w_ref, b_ref, x_ref, o_ref):
    # nn.Linear(1, 1) reduces exactly to y = w * x + b (pure VPU elementwise).
    # Compute in f32 (parameter dtype), cast only on store.
    w = w_ref[0, 0]  # f32 scalar from SMEM
    b = b_ref[0, 0]  # f32 scalar from SMEM
    o_ref[...] = (x_ref[...].astype(jnp.float32) * w + b).astype(o_ref.dtype)


def linear_forward(x, weight, bias):
    """y = x @ weight.T + bias for nn.Linear(1, 1), as a lane-dense Pallas kernel."""
    n, in_f = x.shape
    out_f, in_f_w = weight.shape
    assert in_f == 1 and in_f_w == 1 and out_f == 1, "kernel only supports Linear(1, 1)"

    out_dtype = x.dtype
    w2 = weight.reshape(1, 1).astype(jnp.float32)
    b2 = bias.reshape(1, 1).astype(jnp.float32)

    # --- tiny-batch short-circuit: launch/pipeline overhead dominates ---
    if n < SMALL_N:
        return (x.astype(jnp.float32) * w2[0, 0] + b2[0, 0]).astype(out_dtype)

    x_flat = x.reshape(-1)          # (n, 1) -> (n,): free bitcast
    n_bulk = (n // LANES) * LANES   # lane-aligned bulk
    rows = n_bulk // LANES

    # Tile rows: ~2 MiB tiles, multiple of 8, but keep the grid >= MIN_GRID steps
    # so both v7x TensorCores get several tiles each.
    tile_rows = min(TILE_ROWS_MAX, _round_up(-(-rows // MIN_GRID), 8))
    if tile_rows >= rows:
        tile_rows = rows            # single full block (always a legal block shape)
    grid = (-(-rows // tile_rows),)  # cdiv; last tile is clamped if it doesn't divide

    if n_bulk == n:
        x_bulk = x_flat.reshape(rows, LANES)          # free bitcast -> zero-copy path
    else:
        # Ragged N: slice off the bulk (one extra pass over the bulk only; the
        # <512-element tail is handled in plain JAX below).
        x_bulk = x_flat[:n_bulk].reshape(rows, LANES)

    itemsize = jnp.dtype(out_dtype).itemsize
    cost = pl.CostEstimate(
        flops=2 * rows * LANES,
        transcendentals=0,
        bytes_accessed=2 * rows * LANES * itemsize,   # bandwidth-bound hint for XLA
    )

    y_bulk = pl.pallas_call(
        linear_kernel,
        out_shape=jax.ShapeDtypeStruct((rows, LANES), out_dtype),
        grid_spec=pltpu.PrefetchScalarGridSpec(
            num_scalar_prefetch=0,
            grid=grid,
            in_specs=[
                pl.BlockSpec(memory_space=pltpu.MemorySpace.SMEM),   # weight (1,1) f32
                pl.BlockSpec(memory_space=pltpu.MemorySpace.SMEM),   # bias   (1,1) f32
                pl.BlockSpec((tile_rows, LANES), lambda i: (i, 0)),  # x slab tile
            ],
            out_specs=pl.BlockSpec((tile_rows, LANES), lambda i: (i, 0)),
        ),
        compiler_params=pltpu.CompilerParams(
            dimension_semantics=("parallel",),
        ),
        cost_estimate=cost,
    )(w2, b2, x_bulk)

    y_bulk = y_bulk.reshape(n_bulk)     # free bitcast
    if n_bulk == n:
        return y_bulk.reshape(n, 1)     # free bitcast: no trim copy

    # Ragged tail (< 512 elements): fused XLA elementwise, then stitch back.
    y_tail = (x_flat[n_bulk:].astype(jnp.float32) * w2[0, 0] + b2[0, 0]).astype(out_dtype)
    return jnp.concatenate([y_bulk, y_tail]).reshape(n, 1)


if __name__ == "__main__":
    key = jax.random.PRNGKey(0)
    kx, kw, kb, kx2, kx3 = jax.random.split(key, 5)

    # Deterministic parameters (mimics nn.Linear's U(-1/sqrt(fan_in), 1/sqrt(fan_in))
    # with fan_in = 1 -> U(-1, 1)).
    weight = jax.random.uniform(kw, (1, 1), dtype=jnp.float32, minval=-1.0, maxval=1.0)
    bias = jax.random.uniform(kb, (1,), dtype=jnp.float32, minval=-1.0, maxval=1.0)

    def ref(xi):
        return xi @ weight.T + bias

    # 1) Tiny batch consistent with Linear(1, 1): exercises the short-circuit path.
    x_small = jax.random.normal(kx, (8, 1), dtype=jnp.float32)
    y_small = linear_forward(x_small, weight, bias)
    jax.block_until_ready(y_small)
    assert y_small.shape == (8, 1) and y_small.dtype == jnp.float32
    assert jnp.allclose(y_small, ref(x_small), atol=1e-6), "mismatch (tiny batch)"

    # 2) N a multiple of 512: fully zero-copy lane-dense Pallas path (grid of 2 tiles).
    x_mid = jax.random.normal(kx2, (8192, 1), dtype=jnp.float32)
    y_mid = linear_forward(x_mid, weight, bias)
    jax.block_until_ready(y_mid)
    assert y_mid.shape == (8192, 1)
    assert jnp.allclose(y_mid, ref(x_mid), atol=1e-6), "mismatch (zero-copy path)"

    # 3) General ragged N: gridded kernel with a clamped last row-tile plus a
    #    160-element JAX tail (100000 = 195*512 + 160).
    x_big = jax.random.normal(kx3, (100_000, 1), dtype=jnp.float32)
    y_big = linear_forward(x_big, weight, bias)
    jax.block_until_ready(y_big)
    assert y_big.shape == (100_000, 1)
    assert jnp.allclose(y_big, ref(x_big), atol=1e-6), "mismatch (ragged path)"

    print("KERNEL_OK")
</pallas_src>

<mosaic_0001>
module attributes {stable_mosaic.version = 11 : i64} {
  func.func @linear_kernel(%arg0: i32, %arg1: memref<1x1xf32, #tpu.memory_space<smem>>, %arg2: memref<1x1xf32, #tpu.memory_space<smem>>, %arg3: memref<8x512xf32, #tpu.memory_space<vmem>>, %arg4: memref<8x512xf32, #tpu.memory_space<vmem>>) attributes {dimension_semantics = [#tpu.dimension_semantics<parallel>], iteration_bounds = array<i64: 2>, scalar_prefetch = 0 : i64, scratch_operands = 0 : i64, tpu.core_type = #tpu.core_type<tc>, window_params = [{transform_indices = @transform_0, window_bounds = array<i64: 1, 1>}, {transform_indices = @transform_1, window_bounds = array<i64: 1, 1>}, {transform_indices = @transform_2, window_bounds = array<i64: 8, 512>}, {transform_indices = @transform_3, window_bounds = array<i64: 8, 512>}]} {
    %c0 = arith.constant 0 : index
    %c0_0 = arith.constant 0 : index
    %0 = memref.load %arg1[%c0, %c0_0] : memref<1x1xf32, #tpu.memory_space<smem>>
    %c0_1 = arith.constant 0 : index
    %c0_2 = arith.constant 0 : index
    %1 = memref.load %arg2[%c0_1, %c0_2] : memref<1x1xf32, #tpu.memory_space<smem>>
    %c0_3 = arith.constant 0 : index
    %c0_4 = arith.constant 0 : index
    %2 = vector.load %arg3[%c0_3, %c0_4] : memref<8x512xf32, #tpu.memory_space<vmem>>, vector<8x512xf32>
    %3 = vector.broadcast %0 : f32 to vector<8x512xf32>
    %4 = arith.mulf %2, %3 : vector<8x512xf32>
    %5 = vector.broadcast %1 : f32 to vector<8x512xf32>
    %6 = arith.addf %4, %5 : vector<8x512xf32>
    %c0_5 = arith.constant 0 : index
    %c0_6 = arith.constant 0 : index
    %7 = vector.load %arg4[%c0_5, %c0_6] : memref<8x512xf32, #tpu.memory_space<vmem>>, vector<8x512xf32>
    tpu.vector_store %arg4[%c0_5, %c0_6], %6 {strides = array<i32>} : memref<8x512xf32, #tpu.memory_space<vmem>>, vector<8x512xf32>,
    return
  }
  func.func @transform_0(%arg0: i32) -> (i32, i32) {
    %c0_i32 = arith.constant 0 : i32
    %c0_i32_0 = arith.constant 0 : i32
    %c0_i32_1 = arith.constant 0 : i32
    return %c0_i32, %c0_i32_0 : i32, i32
  }
  func.func @transform_1(%arg0: i32) -> (i32, i32) {
    %c0_i32 = arith.constant 0 : i32
    %c0_i32_0 = arith.constant 0 : i32
    %c0_i32_1 = arith.constant 0 : i32
    return %c0_i32, %c0_i32_0 : i32, i32
  }
  func.func @transform_2(%arg0: i32) -> (i32, i32) {
    %c0_i32 = arith.constant 0 : i32
    %c0_i32_0 = arith.constant 0 : i32
    return %arg0, %c0_i32 : i32, i32
  }
  func.func @transform_3(%arg0: i32) -> (i32, i32) {
    %c0_i32 = arith.constant 0 : i32
    %c0_i32_0 = arith.constant 0 : i32
    return %arg0, %c0_i32 : i32, i32
  }
}

</mosaic_0001>

<bundles_post_ra>
// kernel: tpu_custom_call.1
= control target key start
LH: loop header
LB: loop body
LE: loop exit
PB: predicated region body
PF: predicated region fallthrough
CT: control target
= control target key end

     0   :  { %s631_s0 = inlined_call_operand.<no memory space> [shape: f32[1,1], index: 0, kind: input, shape index: {}]   ;;  %s632_s1 = inlined_call_operand.<no memory space> [shape: f32[1,1], index: 1, kind: input, shape index: {}]   ;;  %s633_s2 = inlined_call_operand.hbm [shape: f32[16,512], index: 2, kind: input, shape index: {}]   ;;  %s634_s3 = inlined_call_operand.hbm [shape: f32[16,512], index: 3, kind: output, shape index: {}]  }
   0x1   :  { %8 = sst [smem:[#allocation2]] %s631_s0 }
   0x2   :  { %9 = sst [smem:[#allocation3]] %s632_s1 }
   0x3   :  { %10 = vsyncpa [#allocation5], 0 }
   0x4   :  { %12 = vsyncpa [#allocation5 + $0x1], 0 }
   0x5   :  { %13 = vsyncpa [#allocation6], 0 }
   0x6   :  { %15 = vsyncpa [#allocation6 + $0x1], 0  ;;  %s478_s16 = smov 0   ;;  %s480_s17 = smov 0  }
   0x7   :  { %s482_s18 = smov 0   ;;  %s484_s19 = smov 0  }
   0x8 LB: > { %s499_s0 = sadd.s32 4294967295, %s448_s19   ;;  %s294_s1 = sadd.s32 4294967294, %s448_s19   ;;  %s448_s19 = sphi %s484_s19, %s651_s19   ;;  %s444_s18 = sphi %s482_s18, %s650_s18   ;;  %s440_s17 = sphi %s480_s17, %s649_s17   ;;  %s436_s16 = sphi %s478_s16, %s648_s16  }
   0x9   : > { %s503_s20 = sadd.s32 1, %s448_s19   ;;  %s70_s21 = sadd.s32 1, %s444_s18 }
   0xa   : > { %s67_s22 = ssub.s32 %s448_s19, %s503_s20  ;;  %p77_p0 = scmp.ne.s32.totalorder %s444_s18, %s440_s17 }
   0xb   : > { %p68_p1 = scmp.eq.s32.totalorder %s67_s22, 0  ;;  %p78_p2 = scmp.eq.s32.totalorder %s448_s19, 0 }
   0xc   : > { %p83_p3 = scmp.ne.s32.totalorder %s440_s17, %s436_s16  ;;  %p84_p4 = scmp.eq.s32.totalorder %s499_s0, 0 }
   0xd   : > { %s515_s23 = scalar_select %p68_p1, %s444_s18, %s70_s21  }
   0xe   : > { %p517_p5 = por %p78_p2, %p77_p0  ;;  %p521_p6 = por %p84_p4, %p83_p3 }
   0xf   : > { %p107_p7 = scmp.eq.s32.totalorder %s499_s0, 1  ;;  %p113_p8 = scmp.eq.s32.totalorder %s294_s1, 1 }
  0x10   : > { %s638_s25 = scalar_select %p521_p6, 1, 0 }
  0x11   : > { %p322_p10 = scmp.lt.s32.totalorder %s448_s19, 2  ;;  %p528_p11 = por %p107_p7, %p77_p0 }
  0x12   : > { %p532_p12 = por %p113_p8, %p83_p3  ;;  %s139_s28 = sand.u32 1, %s444_s18  }
  0x13   : > { %s639_s26 = scalar_select %p528_p11, 1, 0 }
  0x14   : > { %s640_s27 = scalar_select %p532_p12, 1, 0 }
  0x15   : > { %s308_s29 = sshll.u32 %s448_s19, 9  ;;  %s297_s30 = sshll.u32 %s139_s28, 5 }
  0x16   : > { %s541_s6 = scalar_lea.hbm %s633_s2, %s308_s29  ;;  %s143_s7 = scalar_lea.vmem [#allocation4], %s297_s30 }
  0x17   : > { %s151_s8 = sshll.u32 %s143_s7, 4  ;;  %p545_p13 = pnand %p322_p10, %p517_p5  ;;  %s549_s8 = int_to_ptr.vmem [resolvable:$true] %s151_s8 }
  0x18   : > { %s140_s10 = scalar_lea.sflag [#allocation5], %s139_s28  ;;  %s356_s11 = scalar_lea.hbm %s541_s6, 512 }
  0x19   : > { %p357_p2 = scmp.ne.s32.totalorder %s541_s6, %s356_s11  ;;  %p358_p3 = pneg %p545_p13 }
  0x1a   : > { %s361_s14 = scalar_lea.hbm %s633_s2, 1024  ;;  %p362_p5 = scmp.lt.s32.totalorder %s541_s6, %s633_s2 }
  0x1b   : > { %p359_p4 = pnand %p358_p3, %p357_p2  ;;  %p363_p8 = scmp.lt.s32.totalorder %s361_s14, %s356_s11 }
  0x1d   : > { %p360_p7 = pneg %p359_p4  ;;  %p364_p10 = por %p363_p8, %p362_p5 }
  0x1f   : > { %p365_p9 = pnand %p364_p10, %p360_p7 }
  0x21   : > { %368 = shalt.err (!%p365_p9)
}
  0x22   : > { %s369_s21 = scalar_lea.vmem %s549_s8, 512  ;;  %s450_s22 = smov [#allocation4]  }
  0x23   : > { %p370_p0 = scmp.ne.s32.totalorder %s549_s8, %s369_s21  ;;  %s374_s24 = sshll.u32 %s450_s22, 4  ;;  %s375_s24 = int_to_ptr.vmem [resolvable:$false] %s374_s24 }
  0x24   : > { %s376_s28 = scalar_lea.vmem %s375_s24, 1024  ;;  %p377_p4 = scmp.lt.s32.totalorder %s549_s8, %s375_s24 }
  0x25   : > { %p372_p1 = pnand %p370_p0, %p358_p3  ;;  %p378_p12 = scmp.lt.s32.totalorder %s376_s28, %s369_s21 }
  0x27   : > { %p373_p2 = pneg %p372_p1  ;;  %p379_p11 = por %p378_p12, %p377_p4 }
  0x29   : > { %p380_p6 = pnand %p379_p11, %p373_p2 }
  0x2b   : > { %383 = shalt.err (!%p380_p6)
}
  0x2c   : > { %317 = dma.hbm_to_vmem [thread:$0]  (!%p545_p13), %s541_s6, 512, %s549_s8, %s140_s10  }
  0x2d   : > { %p642_p9 = scmp.lt.s32.totalorder %s448_s19, 3  ;;  %p643_p7 = scmp.ge.s32.totalorder %s448_s19, 1 }
  0x2f   : > { %p157_p0 = pnand %p643_p7, %p642_p9 }
  0x30   : > { %s576_s29 = sand.u32 (!%p157_p0), 1, %s440_s17   ;;  %p644_p6 = scmp.ne.s32.totalorder (!%p157_p0), %s638_s25, 0 }
  0x31   : > { %160 = sbr.rel (%p157_p0) target bundleno = 81 (0x51), region = 32  ;;  %s301_s30 = sshll.u32 (!%p157_p0), %s576_s29, 5 }
  0x32   : > { %s163_s4 = scalar_lea.sflag (!%p157_p0), [#allocation5], %s576_s29  ;;  %s166_s5 = scalar_lea.vmem (!%p157_p0), [#allocation4], %s301_s30 }
  0x36   : > { %427 = dma.done.wait (%p644_p6), %s163_s4, 512  }
  0x37   : > { %429 = vsyncadd (%p644_p6), %s163_s4, 4294966784  ;;  %s189_s6 = sld [smem:[#allocation2]]  ;;  %v191_v0 = vld [vmem:[%s166_s5] sm:$0xff]  ;;  %v192_v2 = vld [vmem:[%s166_s5 + $0x8] sm:$0xff]  ;;  %s188_s8 = scalar_lea.vmem [#allocation7], %s301_s30 }
  0x38   : > { %s190_s7 = sld [smem:[#allocation3]]  ;;  %v193_v3 = vld [vmem:[%s166_s5 + $0x10] sm:$0xff]  ;;  %s224_s9 = sshll.u32 %s188_s8, 4  ;;  %v194_v8 = vld [vmem:[%s166_s5 + $0x18] sm:$0xff]  ;;  %s585_s9 = int_to_ptr.vmem [resolvable:$true] %s224_s9 }
  0x39   : > { %s309_s10 = sshll.u32 %s499_s0, 9  ;;  %s210_s0 = scalar_lea.sflag [#allocation6], %s576_s29 }
  0x3a   : > { %s590_s12 = scalar_lea.hbm %s634_s3, %s309_s10  ;;  %s384_s13 = scalar_lea.vmem %s585_s9, 512 }
  0x3b   : > { %p385_p11 = scmp.ne.s32.totalorder %s585_s9, %s384_s13  ;;  %p645_p12 = scmp.ne.s32.totalorder %s639_s26, 0 }
  0x3c   : > { %s451_s14 = smov [#allocation7]  }
  0x3d   : > { %v195_v1 = vstv %s189_s6  ;;  %p386_p13 = pnand %p385_p11, %p645_p12  ;;  %s388_s15 = sshll.u32 %s451_s14, 4  ;;  %s389_s15 = int_to_ptr.vmem [resolvable:$false] %s388_s15 }
  0x3e   : > { %v196_v4 = vmul.f32 %v195_v1, %v191_v0  ;;  %v200_v5 = vstv %s190_s7  ;;  %v197_v6 = vmul.f32 %v195_v1, %v192_v2  ;;  %v198_v7 = vmul.f32 %v195_v1, %v193_v3  ;;  %s390_s1 = scalar_lea.vmem %s389_s15, 1024  ;;  %p391_p3 = scmp.lt.s32.totalorder %s585_s9, %s389_s15 }
  0x3f   : > { %v199_v9 = vmul.f32 %v195_v1, %v194_v8  ;;  %p387_p1 = pneg %p386_p13  ;;  %p392_p5 = scmp.lt.s32.totalorder %s390_s1, %s384_s13 }
  0x40   : > { %v201_v10 = vadd.f32 %v200_v5, %v196_v4  ;;  %v202_v11 = vadd.f32 %v200_v5, %v197_v6  ;;  %v203_v12 = vadd.f32 %v200_v5, %v198_v7 }
  0x41   : > { %v204_v13 = vadd.f32 %v200_v5, %v199_v9  ;;  %p393_p8 = por %p392_p5, %p391_p3 }
  0x42   : > { %205 = vst [vmem:[%s188_s8] sm:$0xff] %v201_v10  ;;  %206 = vst [vmem:[%s188_s8 + $0x8] sm:$0xff] %v202_v11 }
  0x43   : > { %207 = vst [vmem:[%s188_s8 + $0x10] sm:$0xff] %v203_v12  ;;  %208 = vst [vmem:[%s188_s8 + $0x18] sm:$0xff] %v204_v13  ;;  %p394_p10 = pnand %p393_p8, %p387_p1 }
  0x45   : > { %397 = shalt.err (!%p394_p10)
}
  0x46   : > { %s398_s21 = scalar_lea.hbm %s590_s12, 512  ;;  %s402_s28 = scalar_lea.hbm %s634_s3, 1024 }
  0x47   : > { %p399_p2 = scmp.ne.s32.totalorder %s590_s12, %s398_s21  ;;  %p403_p7 = scmp.lt.s32.totalorder %s590_s12, %s634_s3 }
  0x48   : > { %p404_p0 = scmp.lt.s32.totalorder %s402_s28, %s398_s21 }
  0x49   : > { %p400_p4 = pnand %p399_p2, %p645_p12 }
  0x4a   : > { %p405_p6 = por %p404_p0, %p403_p7 }
  0x4b   : > { %p401_p9 = pneg %p400_p4 }
  0x4d   : > { %p406_p11 = pnand %p405_p6, %p401_p9 }
  0x4f   : > { %409 = shalt.err (!%p406_p11)
}
  0x50   : > { %312 = dma.vmem_to_hbm [thread:$0]  (%p645_p12), %s585_s9, 512, %s590_s12, %s210_s0  }
  0x51 PF: > { %s236_s4 = sand.u32 1, %s436_s16   ;;  %p646_p13 = scmp.ne.s32.totalorder %s640_s27, 0 }
  0x52   : > { %p647_p1 = scmp.ge.s32.totalorder %s448_s19, 2  ;;  %s237_s5 = scalar_lea.sflag [#allocation6], %s236_s4 }
  0x54   : > { %p319_p3 = pnand %p647_p1, %p646_p13 }
  0x56   : > { %p320_p5 = pneg %p319_p3 }
  0x58   : > { %431 = dma.done.wait (%p320_p5), %s237_s5, 512  }
  0x59   : > { %433 = vsyncadd (%p320_p5), %s237_s5, 4294966784  ;;  %p18_p8 = scmp.ge.s32.totalorder %s503_s20, 4   ;;  %s648_s16 = smov %s440_s17 }
  0x5a   : > { %s649_s17 = smov %s444_s18  ;;  %s650_s18 = smov %s515_s23 }
  0x5b   : > { %s651_s19 = smov %s503_s20  ;;  %20 = sbr.rel (!%p18_p8) target bundleno = 8 (0x8), region = 77 }
  0x60   :  { %242 = vsyncpa [#allocation5], 1 }
  0x61   :  { %244 = vsyncpa [#allocation5 + $0x1], 1 }
  0x62   :  { %245 = vsyncpa [#allocation6], 1 }
  0x63   :  { %247 = vsyncpa [#allocation6 + $0x1], 1 }

</bundles_post_ra>
